<compile_context>
chip_gen: v7x
topology: tpu7x:2x2x1
jax: 0.10.0
libtpu: 0.0.40
codegen_flags: <defaults>
</compile_context>

<pallas_src>
import numpy as np

import jax
import jax.numpy as jnp
from jax.experimental import pallas as pl
from jax.experimental.pallas import tpu as pltpu

HIDDEN = 256
LANE = 128


def _round_up(x, m):
    return (x + m - 1) // m * m


def _elu(x):
    # PyTorch nn.ELU (alpha=1.0): x if x > 0 else exp(x) - 1.
    # Clamp the dead branch so the always-evaluated exp never overflows.
    return jnp.where(x > 0, x, jnp.exp(jnp.minimum(x, 0.0)) - 1.0)


def mappingnet_kernel(z_ref, w1_ref, b1_ref, w2_ref, b2_ref, w3_ref, b3_ref, o_ref):
    z = z_ref[...]
    h = jnp.dot(z, w1_ref[...], preferred_element_type=jnp.float32) + b1_ref[...]
    h = _elu(h)
    h = jnp.dot(h, w2_ref[...], preferred_element_type=jnp.float32) + b2_ref[...]
    h = _elu(h)
    h = jnp.dot(h, w3_ref[...], preferred_element_type=jnp.float32) + b3_ref[...]
    # sigmoid: exp and approximate reciprocal both go to the EUP slot.
    o_ref[...] = pl.reciprocal(1.0 + jnp.exp(-h), approx=True)


@jax.jit
def _mappingnet_pallas(z, w1, b1, w2, b2, w3, b3):
    """z: (B, n_z) float32. Weights are (in, out). Returns (B, n_out) float32."""
    B, n_z = z.shape
    n_out = w3.shape[1]

    # Batch tile: multiple of 8 (f32 sublane). 256 rows feeds the 256-wide MXU
    # on v6e/v7x; per-step VMEM (2 pipelined bufs of z/out + ~300 KB resident
    # weights + intermediates) stays far under v7x's 64 MiB VMEM.
    tile_b = min(256, _round_up(B, 8))
    b_pad = _round_up(B, tile_b)

    # Lane-dense output: pad n_out up to a multiple of 128 (unmasked vst).
    n_out_p = _round_up(n_out, LANE)

    if b_pad != B:
        z = jnp.pad(z, ((0, b_pad - B), (0, 0)))
    if n_out_p != n_out:
        w3 = jnp.pad(w3, ((0, 0), (0, n_out_p - n_out)))
        b3 = jnp.pad(b3, ((0, 0), (0, n_out_p - n_out)))

    grid_b = b_pad // tile_b

    # Constant index_map -> block fetched once, stays resident in VMEM.
    resident = lambda shape: pl.BlockSpec(shape, lambda i: (0, 0))

    out = pl.pallas_call(
        mappingnet_kernel,
        out_shape=jax.ShapeDtypeStruct((b_pad, n_out_p), jnp.float32),
        grid_spec=pltpu.PrefetchScalarGridSpec(
            num_scalar_prefetch=0,
            grid=(grid_b,),
            in_specs=[
                pl.BlockSpec((tile_b, n_z), lambda i: (i, 0)),  # z tile (pipelined)
                resident((n_z, HIDDEN)),
                resident((1, HIDDEN)),
                resident((HIDDEN, HIDDEN)),
                resident((1, HIDDEN)),
                resident((HIDDEN, n_out_p)),
                resident((1, n_out_p)),
            ],
            out_specs=pl.BlockSpec((tile_b, n_out_p), lambda i: (i, 0)),
        ),
        compiler_params=pltpu.CompilerParams(
            dimension_semantics=("parallel",),  # shard batch tiles across TCs (v7x)
        ),
    )(z, w1, b1, w2, b2, w3, b3)

    return out[:B, :n_out]


def mappingnet_forward(z, w1, b1, w2, b2, w3, b3):
    """Matches MappingNet.forward; the trailing .to(torch.float64) runs on host."""
    out_f32 = jax.block_until_ready(_mappingnet_pallas(z, w1, b1, w2, b2, w3, b3))
    # TODO(synk): f64 has no TPU hardware path; keep the dtype-contract cast off-device.
    return np.asarray(out_f32, dtype=np.float64)


def xavier_uniform(key, fan_in, fan_out, dtype=jnp.float32):
    # matches torch.nn.init.xavier_uniform_ (gain=1.0); stored as (in, out)
    limit = jnp.sqrt(6.0 / (fan_in + fan_out)).astype(dtype)
    return jax.random.uniform(key, (fan_in, fan_out), dtype, -limit, limit)


def init_params(key, n_z_dim, n_x_dim):
    k1, k2, k3 = jax.random.split(key, 3)
    w1 = xavier_uniform(k1, n_z_dim, HIDDEN)
    b1 = jnp.zeros((1, HIDDEN), jnp.float32)
    w2 = xavier_uniform(k2, HIDDEN, HIDDEN)
    b2 = jnp.zeros((1, HIDDEN), jnp.float32)
    w3 = xavier_uniform(k3, HIDDEN, n_x_dim)
    b3 = jnp.zeros((1, n_x_dim), jnp.float32)
    return w1, b1, w2, b2, w3, b3


if __name__ == "__main__":
    key = jax.random.PRNGKey(0)
    kz, kp = jax.random.split(key)

    batch = 8
    n_z_dim = 32
    n_x_dim = 16

    z = jax.random.normal(kz, (batch, n_z_dim), dtype=jnp.float32)
    params = init_params(kp, n_z_dim, n_x_dim)

    out = mappingnet_forward(z, *params)

    # reference check in plain JAX (f32 math, host f64 cast)
    w1, b1, w2, b2, w3, b3 = params
    pre1 = z @ w1 + b1
    h = jnp.where(pre1 > 0, pre1, jnp.expm1(pre1))
    pre2 = h @ w2 + b2
    h = jnp.where(pre2 > 0, pre2, jnp.expm1(pre2))
    ref = np.asarray(jax.nn.sigmoid(h @ w3 + b3), dtype=np.float64)

    assert out.shape == (batch, n_x_dim) and out.dtype == np.float64
    # tolerance covers the EUP approximate-reciprocal sigmoid (~2^-12 rel err)
    assert np.allclose(out, ref, atol=2e-3), "mismatch vs reference"

    print("KERNEL_OK")
</pallas_src>

<mosaic_0001>
module attributes {stable_mosaic.version = 11 : i64} {
  func.func @mappingnet_kernel(%arg0: i32, %arg1: memref<8x32xf32, #tpu.memory_space<vmem>>, %arg2: memref<32x256xf32, #tpu.memory_space<vmem>>, %arg3: memref<1x256xf32, #tpu.memory_space<vmem>>, %arg4: memref<256x256xf32, #tpu.memory_space<vmem>>, %arg5: memref<1x256xf32, #tpu.memory_space<vmem>>, %arg6: memref<256x128xf32, #tpu.memory_space<vmem>>, %arg7: memref<1x128xf32, #tpu.memory_space<vmem>>, %arg8: memref<8x128xf32, #tpu.memory_space<vmem>>) attributes {dimension_semantics = [#tpu.dimension_semantics<parallel>], iteration_bounds = array<i64: 1>, scalar_prefetch = 0 : i64, scratch_operands = 0 : i64, tpu.core_type = #tpu.core_type<tc>, window_params = [{transform_indices = @transform_0, window_bounds = array<i64: 8, 32>}, {pipeline_mode = #tpu.pipeline_mode<synchronous>, transform_indices = @transform_1, window_bounds = array<i64: 32, 256>}, {pipeline_mode = #tpu.pipeline_mode<synchronous>, transform_indices = @transform_2, window_bounds = array<i64: 1, 256>}, {pipeline_mode = #tpu.pipeline_mode<synchronous>, transform_indices = @transform_3, window_bounds = array<i64: 256, 256>}, {pipeline_mode = #tpu.pipeline_mode<synchronous>, transform_indices = @transform_4, window_bounds = array<i64: 1, 256>}, {pipeline_mode = #tpu.pipeline_mode<synchronous>, transform_indices = @transform_5, window_bounds = array<i64: 256, 128>}, {pipeline_mode = #tpu.pipeline_mode<synchronous>, transform_indices = @transform_6, window_bounds = array<i64: 1, 128>}, {transform_indices = @transform_7, window_bounds = array<i64: 8, 128>}]} {
    %c0 = arith.constant 0 : index
    %c0_0 = arith.constant 0 : index
    %0 = vector.load %arg1[%c0, %c0_0] : memref<8x32xf32, #tpu.memory_space<vmem>>, vector<8x32xf32>
    %c0_1 = arith.constant 0 : index
    %c0_2 = arith.constant 0 : index
    %1 = vector.load %arg2[%c0_1, %c0_2] : memref<32x256xf32, #tpu.memory_space<vmem>>, vector<32x256xf32>
    %cst = arith.constant dense<0.000000e+00> : vector<8x256xf32>
    %2 = tpu.matmul %0, %1, %cst {dimension_numbers = #tpu.dot_dimension_numbers<[1], [0], [0], [1], [0, 0, 1, 1], [], []>} : vector<8x32xf32>, vector<32x256xf32>, vector<8x256xf32> -> vector<8x256xf32>
    %c0_3 = arith.constant 0 : index
    %c0_4 = arith.constant 0 : index
    %3 = vector.load %arg3[%c0_3, %c0_4] : memref<1x256xf32, #tpu.memory_space<vmem>>, vector<1x256xf32>
    %4 = vector.broadcast %3 : vector<1x256xf32> to vector<8x256xf32>
    %5 = arith.addf %2, %4 : vector<8x256xf32>
    %cst_5 = arith.constant 0.000000e+00 : f32
    %6 = vector.broadcast %cst_5 : f32 to vector<8x256xf32>
    %7 = arith.cmpf ogt, %5, %6 : vector<8x256xf32>
    %cst_6 = arith.constant 0.000000e+00 : f32
    %8 = vector.broadcast %cst_6 : f32 to vector<8x256xf32>
    %9 = arith.minimumf %5, %8 : vector<8x256xf32>
    %10 = math.exp %9 : vector<8x256xf32>
    %cst_7 = arith.constant 1.000000e+00 : f32
    %11 = vector.broadcast %cst_7 : f32 to vector<8x256xf32>
    %12 = arith.subf %10, %11 : vector<8x256xf32>
    %13 = arith.select %7, %5, %12 : vector<8x256xi1>, vector<8x256xf32>
    %c0_8 = arith.constant 0 : index
    %c0_9 = arith.constant 0 : index
    %14 = vector.load %arg4[%c0_8, %c0_9] : memref<256x256xf32, #tpu.memory_space<vmem>>, vector<256x256xf32>
    %cst_10 = arith.constant dense<0.000000e+00> : vector<8x256xf32>
    %15 = tpu.matmul %13, %14, %cst_10 {dimension_numbers = #tpu.dot_dimension_numbers<[1], [0], [0], [1], [0, 0, 1, 1], [], []>} : vector<8x256xf32>, vector<256x256xf32>, vector<8x256xf32> -> vector<8x256xf32>
    %c0_11 = arith.constant 0 : index
    %c0_12 = arith.constant 0 : index
    %16 = vector.load %arg5[%c0_11, %c0_12] : memref<1x256xf32, #tpu.memory_space<vmem>>, vector<1x256xf32>
    %17 = vector.broadcast %16 : vector<1x256xf32> to vector<8x256xf32>
    %18 = arith.addf %15, %17 : vector<8x256xf32>
    %cst_13 = arith.constant 0.000000e+00 : f32
    %19 = vector.broadcast %cst_13 : f32 to vector<8x256xf32>
    %20 = arith.cmpf ogt, %18, %19 : vector<8x256xf32>
    %cst_14 = arith.constant 0.000000e+00 : f32
    %21 = vector.broadcast %cst_14 : f32 to vector<8x256xf32>
    %22 = arith.minimumf %18, %21 : vector<8x256xf32>
    %23 = math.exp %22 : vector<8x256xf32>
    %cst_15 = arith.constant 1.000000e+00 : f32
    %24 = vector.broadcast %cst_15 : f32 to vector<8x256xf32>
    %25 = arith.subf %23, %24 : vector<8x256xf32>
    %26 = arith.select %20, %18, %25 : vector<8x256xi1>, vector<8x256xf32>
    %c0_16 = arith.constant 0 : index
    %c0_17 = arith.constant 0 : index
    %27 = vector.load %arg6[%c0_16, %c0_17] : memref<256x128xf32, #tpu.memory_space<vmem>>, vector<256x128xf32>
    %cst_18 = arith.constant dense<0.000000e+00> : vector<8x128xf32>
    %28 = tpu.matmul %26, %27, %cst_18 {dimension_numbers = #tpu.dot_dimension_numbers<[1], [0], [0], [1], [0, 0, 1, 1], [], []>} : vector<8x256xf32>, vector<256x128xf32>, vector<8x128xf32> -> vector<8x128xf32>
    %c0_19 = arith.constant 0 : index
    %c0_20 = arith.constant 0 : index
    %29 = vector.load %arg7[%c0_19, %c0_20] : memref<1x128xf32, #tpu.memory_space<vmem>>, vector<1x128xf32>
    %30 = vector.broadcast %29 : vector<1x128xf32> to vector<8x128xf32>
    %31 = arith.addf %28, %30 : vector<8x128xf32>
    %cst_21 = arith.constant 0.000000e+00 : f32
    %32 = vector.broadcast %cst_21 : f32 to vector<8x128xf32>
    %33 = arith.subf %32, %31 : vector<8x128xf32>
    %34 = math.exp %33 : vector<8x128xf32>
    %cst_22 = arith.constant 1.000000e+00 : f32
    %35 = vector.broadcast %cst_22 : f32 to vector<8x128xf32>
    %36 = arith.addf %35, %34 : vector<8x128xf32>
    %37 = tpu.reciprocal %36 {approx = true} : vector<8x128xf32> -> vector<8x128xf32>
    %c0_23 = arith.constant 0 : index
    %c0_24 = arith.constant 0 : index
    %38 = vector.load %arg8[%c0_23, %c0_24] : memref<8x128xf32, #tpu.memory_space<vmem>>, vector<8x128xf32>
    tpu.vector_store %arg8[%c0_23, %c0_24], %37 {strides = array<i32>} : memref<8x128xf32, #tpu.memory_space<vmem>>, vector<8x128xf32>,
    return
  }
  func.func @transform_0(%arg0: i32) -> (i32, i32) {
    %c0_i32 = arith.constant 0 : i32
    %c0_i32_0 = arith.constant 0 : i32
    return %arg0, %c0_i32 : i32, i32
  }
  func.func @transform_1(%arg0: i32) -> (i32, i32) {
    %c0_i32 = arith.constant 0 : i32
    %c0_i32_0 = arith.constant 0 : i32
    %c0_i32_1 = arith.constant 0 : i32
    return %c0_i32, %c0_i32_0 : i32, i32
  }
  func.func @transform_2(%arg0: i32) -> (i32, i32) {
    %c0_i32 = arith.constant 0 : i32
    %c0_i32_0 = arith.constant 0 : i32
    %c0_i32_1 = arith.constant 0 : i32
    return %c0_i32, %c0_i32_0 : i32, i32
  }
  func.func @transform_3(%arg0: i32) -> (i32, i32) {
    %c0_i32 = arith.constant 0 : i32
    %c0_i32_0 = arith.constant 0 : i32
    %c0_i32_1 = arith.constant 0 : i32
    return %c0_i32, %c0_i32_0 : i32, i32
  }
  func.func @transform_4(%arg0: i32) -> (i32, i32) {
    %c0_i32 = arith.constant 0 : i32
    %c0_i32_0 = arith.constant 0 : i32
    %c0_i32_1 = arith.constant 0 : i32
    return %c0_i32, %c0_i32_0 : i32, i32
  }
  func.func @transform_5(%arg0: i32) -> (i32, i32) {
    %c0_i32 = arith.constant 0 : i32
    %c0_i32_0 = arith.constant 0 : i32
    %c0_i32_1 = arith.constant 0 : i32
    return %c0_i32, %c0_i32_0 : i32, i32
  }
  func.func @transform_6(%arg0: i32) -> (i32, i32) {
    %c0_i32 = arith.constant 0 : i32
    %c0_i32_0 = arith.constant 0 : i32
    %c0_i32_1 = arith.constant 0 : i32
    return %c0_i32, %c0_i32_0 : i32, i32
  }
  func.func @transform_7(%arg0: i32) -> (i32, i32) {
    %c0_i32 = arith.constant 0 : i32
    %c0_i32_0 = arith.constant 0 : i32
    return %arg0, %c0_i32 : i32, i32
  }
}

</mosaic_0001>

<bundles_post_ra>
// kernel: _mappingnet_pallas.1
= control target key start
LH: loop header
LB: loop body
LE: loop exit
PB: predicated region body
PF: predicated region fallthrough
CT: control target
= control target key end

     0   :  { %v606_v7 = vmov 0.0   ;;  %vm48_vm0 = vcmask 261120   ;;  %s996_s0 = inlined_call_operand.vmem [shape: f32[8,32], index: 0, kind: input, shape index: {}]   ;;  %s997_s1 = inlined_call_operand.vmem [shape: f32[32,256], index: 1, kind: input, shape index: {}]   ;;  %s998_s2 = inlined_call_operand.vmem [shape: f32[1,256], index: 2, kind: input, shape index: {}]   ;;  %s999_s3 = inlined_call_operand.vmem [shape: f32[256,256], index: 3, kind: input, shape index: {}]   ;;  %s1000_s4 = inlined_call_operand.vmem [shape: f32[1,256], index: 4, kind: input, shape index: {}]   ;;  %s1001_s5 = inlined_call_operand.vmem [shape: f32[256,128], index: 5, kind: input, shape index: {}]   ;;  %s1002_s6 = inlined_call_operand.vmem [shape: f32[1,128], index: 6, kind: input, shape index: {}]   ;;  %s1003_s7 = inlined_call_operand.hbm [shape: f32[8,128], index: 7, kind: output, shape index: {}]  }
   0x1   :  { %v29_v0 = vld [vmem:[%s997_s1 + $0x8] sm:$0xff]  ;;  %v31_v1 = vld [vmem:[%s997_s1 + $0x18] sm:$0xff]  ;;  %v28_v2 = vld [vmem:[%s997_s1] sm:$0xff]  ;;  %116 = vmatprep.mubr.f32.mxu0 %v606_v7 }
   0x2   :  { %v464_v3 = vpack.c.bf16 %v31_v1, %v29_v0  ;;  %v30_v4 = vld [vmem:[%s997_s1 + $0x10] sm:$0xff]  ;;  %v33_v5 = vld [vmem:[%s997_s1 + $0x28] sm:$0xff]  ;;  %v35_v6 = vld [vmem:[%s997_s1 + $0x38] sm:$0xff] }
   0x3   :  { %v466_v8 = vpack.c.bf16 %v30_v4, %v28_v2  ;;  %v468_v9 = vpack.c.bf16 %v35_v6, %v33_v5  ;;  %v32_v10 = vld [vmem:[%s997_s1 + $0x20] sm:$0xff]  ;;  %v34_v11 = vld [vmem:[%s997_s1 + $0x30] sm:$0xff]  ;;  %v136_v12 = vld [vmem:[%s999_s3 + $0x8] sm:$0xff] }
   0x4   :  { %465 = vmatprep.subr.bf16.mxu0 %v464_v3  ;;  %v138_v13 = vld [vmem:[%s999_s3 + $0x18] sm:$0xff]  ;;  %v135_v14 = vld [vmem:[%s999_s3] sm:$0xff]  ;;  %v470_v15 = vpack.c.bf16 %v34_v11, %v32_v10  ;;  %v137_v17 = vld [vmem:[%s999_s3 + $0x10] sm:$0xff] }
   0x5   :  { %467 = vmatpush1.bf16.msra.mxu0 %v466_v8  ;;  %v472_v16 = vpack.c.bf16 %v138_v13, %v136_v12  ;;  %v140_v18 = vld [vmem:[%s999_s3 + $0x28] sm:$0xff]  ;;  %v142_v19 = vld [vmem:[%s999_s3 + $0x38] sm:$0xff]  ;;  %v474_v20 = vpack.c.bf16 %v137_v17, %v135_v14  ;;  %v139_v22 = vld [vmem:[%s999_s3 + $0x20] sm:$0xff] }
   0x6   :  { %469 = vmatprep.subr.bf16.mxu0 %v468_v9  ;;  %v476_v21 = vpack.c.bf16 %v142_v19, %v140_v18  ;;  %v141_v23 = vld [vmem:[%s999_s3 + $0x30] sm:$0xff]  ;;  %v144_v24 = vld [vmem:[%s999_s3 + $0x48] sm:$0xff]  ;;  %v146_v25 = vld [vmem:[%s999_s3 + $0x58] sm:$0xff] }
   0x7   :  { %473 = vmatprep.subr.bf16.mxu1 %v472_v16  ;;  %v478_v26 = vpack.c.bf16 %v141_v23, %v139_v22  ;;  %v27_v27 = vld [vmem:[%s996_s0] sm:$0xff]  ;;  %v480_v28 = vpack.c.bf16 %v146_v25, %v144_v24  ;;  %v145_v30 = vld [vmem:[%s999_s3 + $0x50] sm:$0xff]  ;;  %v148_v31 = vld [vmem:[%s999_s3 + $0x68] sm:$0xff] }
   0x8   :  { %475 = vmatpush1.bf16.msra.mxu1 %v474_v20  ;;  %v143_v29 = vld [vmem:[%s999_s3 + $0x40] sm:$0xff]  ;;  %v150_v32 = vld [vmem:[%s999_s3 + $0x78] sm:$0xff]  ;;  %v149_v36 = vld [vmem:[%s999_s3 + $0x70] sm:$0xff] }
   0x9   :  { %471 = vmatpush1.bf16.msra.mxu0 %v470_v15  ;;  %477 = vmatprep.subr.bf16.mxu1 %v476_v21  ;;  %v482_v33 = vpack.c.bf16 %v145_v30, %v143_v29  ;;  %v484_v34 = vpack.c.bf16 %v150_v32, %v148_v31  ;;  %v147_v35 = vld [vmem:[%s999_s3 + $0x60] sm:$0xff]  ;;  %v152_v37 = vld [vmem:[%s999_s3 + $0x88] sm:$0xff]  ;;  %v154_v38 = vld [vmem:[%s999_s3 + $0x98] sm:$0xff] }
   0xa   :  { %v486_v39 = vpack.c.bf16 %v149_v36, %v147_v35  ;;  %v488_v40 = vpack.c.bf16 %v154_v38, %v152_v37  ;;  %v151_v41 = vld [vmem:[%s999_s3 + $0x80] sm:$0xff]  ;;  %v153_v42 = vld [vmem:[%s999_s3 + $0x90] sm:$0xff]  ;;  %v156_v43 = vld [vmem:[%s999_s3 + $0xa8] sm:$0xff] }
   0xb   :  { %v158_v44 = vld [vmem:[%s999_s3 + $0xb8] sm:$0xff] }
   0xc   :  { %423 = vmatmul.mubr.msk.f32.vlgmr.msra.gmra.mrb[0].mxu0 %vm48_vm0, %v27_v27  ;;  %479 = vmatpush1.bf16.msra.mxu1 %v478_v26 }
   0xd   :  { %481 = vmatprep.subr.bf16.mxu1 %v480_v28 }
  0x10   :  { %483 = vmatpush1.bf16.msra.mxu1 %v482_v33 }
  0x11   :  { %485 = vmatprep.subr.bf16.mxu1 %v484_v34 }
  0x12   :  { %12 = vsyncpa [#allocation3], 0  ;;  %v490_v45 = vpack.c.bf16 %v153_v42, %v151_v41  ;;  %v492_v46 = vpack.c.bf16 %v158_v44, %v156_v43  ;;  %v155_v47 = vld [vmem:[%s999_s3 + $0xa0] sm:$0xff]  ;;  %v157_v48 = vld [vmem:[%s999_s3 + $0xb0] sm:$0xff]  ;;  %s607_s11 = smov [#allocation2]  }
  0x13   :  { %v160_v49 = vld [vmem:[%s999_s3 + $0xc8] sm:$0xff]  ;;  %v162_v50 = vld [vmem:[%s999_s3 + $0xd8] sm:$0xff]  ;;  %v494_v51 = vpack.c.bf16 %v157_v48, %v155_v47  ;;  %v159_v53 = vld [vmem:[%s999_s3 + $0xc0] sm:$0xff]  ;;  %s415_s12 = sshll.u32 %s607_s11, 4  ;;  %s416_s12 = int_to_ptr.vmem [resolvable:$true] %s415_s12 }
  0x14   :  { %487 = vmatpush1.bf16.msra.mxu1 %v486_v39  ;;  %v496_v52 = vpack.c.bf16 %v162_v50, %v160_v49  ;;  %v161_v54 = vld [vmem:[%s999_s3 + $0xd0] sm:$0xff]  ;;  %v164_v55 = vld [vmem:[%s999_s3 + $0xe8] sm:$0xff]  ;;  %v166_v56 = vld [vmem:[%s999_s3 + $0xf8] sm:$0xff]  ;;  %s582_s13 = scalar_lea.vmem %s416_s12, 128  ;;  %p587_p1 = scmp.lt.s32.totalorder %s416_s12, %s416_s12 }
  0x15   :  { %489 = vmatprep.subr.bf16.mxu1 %v488_v40  ;;  %v498_v57 = vpack.c.bf16 %v161_v54, %v159_v53  ;;  %v500_v58 = vpack.c.bf16 %v166_v56, %v164_v55  ;;  %v163_v59 = vld [vmem:[%s999_s3 + $0xe0] sm:$0xff]  ;;  %v165_v60 = vld [vmem:[%s999_s3 + $0xf0] sm:$0xff]  ;;  %v168_v61 = vld [vmem:[%s999_s3 + $0x108] sm:$0xff]  ;;  %p583_p0 = scmp.ne.s32.totalorder %s416_s12, %s582_s13  ;;  %p588_p2 = scmp.lt.s32.totalorder %s582_s13, %s582_s13 }
  0x16   :  { %v170_v62 = vld [vmem:[%s999_s3 + $0x118] sm:$0xff]  ;;  %v502_v63 = vpack.c.bf16 %v165_v60, %v163_v59  ;;  %v167_v1 = vld [vmem:[%s999_s3 + $0x100] sm:$0xff]  ;;  %v169_v2 = vld [vmem:[%s999_s3 + $0x110] sm:$0xff] }
  0x17   :  { %v504_v0 = vpack.c.bf16 %v170_v62, %v168_v61  ;;  %v172_v3 = vld [vmem:[%s999_s3 + $0x128] sm:$0xff]  ;;  %v174_v4 = vld [vmem:[%s999_s3 + $0x138] sm:$0xff]  ;;  %v506_v5 = vpack.c.bf16 %v169_v2, %v167_v1  ;;  %v171_v7 = vld [vmem:[%s999_s3 + $0x120] sm:$0xff]  ;;  %v38_v61 = vlaneseq  ;;  %p589_p3 = por %p588_p2, %p587_p1 }
  0x18   :  { %491 = vmatpush1.bf16.msra.mxu1 %v490_v45  ;;  %v508_v6 = vpack.c.bf16 %v174_v4, %v172_v3  ;;  %v173_v8 = vld [vmem:[%s999_s3 + $0x130] sm:$0xff]  ;;  %v176_v9 = vld [vmem:[%s999_s3 + $0x148] sm:$0xff]  ;;  %v178_v10 = vld [vmem:[%s999_s3 + $0x158] sm:$0xff] }
  0x19   :  { %493 = vmatprep.subr.bf16.mxu1 %v492_v46  ;;  %v510_v11 = vpack.c.bf16 %v173_v8, %v171_v7  ;;  %v512_v12 = vpack.c.bf16 %v178_v10, %v176_v9  ;;  %v175_v13 = vld [vmem:[%s999_s3 + $0x140] sm:$0xff]  ;;  %v177_v14 = vld [vmem:[%s999_s3 + $0x150] sm:$0xff]  ;;  %v180_v16 = vld [vmem:[%s999_s3 + $0x168] sm:$0xff]  ;;  %v897_v62 = vshrl.u32 %v38_v61, 7  ;;  %p590_p4 = pnand %p589_p3, %p583_p0 }
  0x1a   :  { %v514_v15 = vpack.c.bf16 %v177_v14, %v175_v13  ;;  %v182_v17 = vld [vmem:[%s999_s3 + $0x178] sm:$0xff]  ;;  %v179_v19 = vld [vmem:[%s999_s3 + $0x160] sm:$0xff]  ;;  %v181_v20 = vld [vmem:[%s999_s3 + $0x170] sm:$0xff] }
  0x1b   :  { %v516_v18 = vpack.c.bf16 %v182_v17, %v180_v16  ;;  %v518_v21 = vpack.c.bf16 %v181_v20, %v179_v19  ;;  %v184_v22 = vld [vmem:[%s999_s3 + $0x188] sm:$0xff]  ;;  %v186_v23 = vld [vmem:[%s999_s3 + $0x198] sm:$0xff]  ;;  %v183_v25 = vld [vmem:[%s999_s3 + $0x180] sm:$0xff]  ;;  %v44_v1 = vsub.s32 1, %v897_v62 }
  0x1c   :  { %495 = vmatpush1.bf16.msra.mxu1 %v494_v51  ;;  %v520_v24 = vpack.c.bf16 %v186_v23, %v184_v22  ;;  %v185_v26 = vld [vmem:[%s999_s3 + $0x190] sm:$0xff]  ;;  %v188_v28 = vld [vmem:[%s999_s3 + $0x1a8] sm:$0xff]  ;;  %v190_v29 = vld [vmem:[%s999_s3 + $0x1b8] sm:$0xff] }
  0x1d   :  { %497 = vmatprep.subr.bf16.mxu1 %v496_v52  ;;  %v522_v27 = vpack.c.bf16 %v185_v26, %v183_v25  ;;  %v187_v30 = vld [vmem:[%s999_s3 + $0x1a0] sm:$0xff]  ;;  %v524_v31 = vpack.c.bf16 %v190_v29, %v188_v28  ;;  %v189_v32 = vld [vmem:[%s999_s3 + $0x1b0] sm:$0xff]  ;;  %v192_v33 = vld [vmem:[%s999_s3 + $0x1c8] sm:$0xff] }
  0x1e   :  { %v194_v34 = vld [vmem:[%s999_s3 + $0x1d8] sm:$0xff]  ;;  %v526_v35 = vpack.c.bf16 %v189_v32, %v187_v30  ;;  %v191_v37 = vld [vmem:[%s999_s3 + $0x1c0] sm:$0xff]  ;;  %v193_v38 = vld [vmem:[%s999_s3 + $0x1d0] sm:$0xff] }
  0x1f   :  { %v528_v36 = vpack.c.bf16 %v194_v34, %v192_v33  ;;  %v196_v39 = vld [vmem:[%s999_s3 + $0x1e8] sm:$0xff]  ;;  %v198_v40 = vld [vmem:[%s999_s3 + $0x1f8] sm:$0xff]  ;;  %v530_v41 = vpack.c.bf16 %v193_v38, %v191_v37  ;;  %v195_v43 = vld [vmem:[%s999_s3 + $0x1e0] sm:$0xff] }
  0x20   :  { %499 = vmatpush1.bf16.msra.mxu1 %v498_v57  ;;  %v532_v42 = vpack.c.bf16 %v198_v40, %v196_v39  ;;  %v197_v44 = vld [vmem:[%s999_s3 + $0x1f0] sm:$0xff]  ;;  %v310_v46 = vld [vmem:[%s1001_s5 + $0x80] sm:$0xff]  ;;  %v311_v47 = vld [vmem:[%s1001_s5 + $0x88] sm:$0xff] }
  0x21   :  { %501 = vmatprep.subr.bf16.mxu1 %v500_v58  ;;  %v534_v45 = vpack.c.bf16 %v197_v44, %v195_v43  ;;  %v294_v48 = vld [vmem:[%s1001_s5] sm:$0xff]  ;;  %v536_v49 = vpack.c.bf16 %v311_v47, %v310_v46  ;;  %v295_v50 = vld [vmem:[%s1001_s5 + $0x8] sm:$0xff]  ;;  %v312_v51 = vld [vmem:[%s1001_s5 + $0x90] sm:$0xff] }
  0x22   :  { %v313_v52 = vld [vmem:[%s1001_s5 + $0x98] sm:$0xff]  ;;  %v538_v53 = vpack.c.bf16 %v295_v50, %v294_v48  ;;  %v296_v55 = vld [vmem:[%s1001_s5 + $0x10] sm:$0xff]  ;;  %v314_v57 = vld [vmem:[%s1001_s5 + $0xa0] sm:$0xff] }
  0x23   :  { %v540_v54 = vpack.c.bf16 %v313_v52, %v312_v51  ;;  %v297_v56 = vld [vmem:[%s1001_s5 + $0x18] sm:$0xff]  ;;  %537 = vmatprep.subr.bf16.mxu0 %v536_v49  ;;  %v315_v58 = vld [vmem:[%s1001_s5 + $0xa8] sm:$0xff]  ;;  %v302_v30 = vld [vmem:[%s1001_s5 + $0x40] sm:$0xff] }
  0x24   :  { %503 = vmatpush1.bf16.msra.mxu1 %v502_v63  ;;  %539 = vmatpush3.bf16.msra.mxu0 %v538_v53  ;;  %v542_v59 = vpack.c.bf16 %v297_v56, %v296_v55  ;;  %v544_v60 = vpack.c.bf16 %v315_v58, %v314_v57  ;;  %v40_v63 = vsub.s32 0, %v897_v62  ;;  %v299_v19 = vld [vmem:[%s1001_s5 + $0x28] sm:$0xff]  ;;  %v317_v22 = vld [vmem:[%s1001_s5 + $0xb8] sm:$0xff]  ;;  %v320_v33 = vld [vmem:[%s1001_s5 + $0xd0] sm:$0xff] }
  0x25   :  { %505 = vmatprep.subr.bf16.mxu1 %v504_v0  ;;  %541 = vmatprep.subr.bf16.mxu0 %v540_v54  ;;  %v36_v0 = vld [vmem:[%s998_s2] sm:$0x3]  ;;  %v301_v25 = vld [vmem:[%s1001_s5 + $0x38] sm:$0xff]  ;;  %v319_v28 = vld [vmem:[%s1001_s5 + $0xc8] sm:$0xff] }
  0x26   :  { %v41_v2 = vrot.slane %v36_v0, %v40_v63  ;;  %v45_v3 = vrot.slane %v36_v0, %v44_v1  ;;  %v321_v34 = vld [vmem:[%s1001_s5 + $0xd8] sm:$0xff]  ;;  %v322_v38 = vld [vmem:[%s1001_s5 + $0xe0] sm:$0xff]  ;;  %v323_v39 = vld [vmem:[%s1001_s5 + $0xe8] sm:$0xff] }
  0x27   :  { %v305_v37 = vld [vmem:[%s1001_s5 + $0x58] sm:$0xff]  ;;  %v307_v43 = vld [vmem:[%s1001_s5 + $0x68] sm:$0xff]  ;;  %v324_v44 = vld [vmem:[%s1001_s5 + $0xf0] sm:$0xff] }
  0x28   :  { %507 = vmatpush1.bf16.msra.mxu1 %v506_v5  ;;  %543 = vmatpush3.bf16.msra.mxu0 %v542_v59  ;;  %v308_v48 = vld [vmem:[%s1001_s5 + $0x70] sm:$0xff]  ;;  %v309_v49 = vld [vmem:[%s1001_s5 + $0x78] sm:$0xff]  ;;  %v199_v51 = vld [vmem:[%s1000_s4] sm:$0x3] }
  0x29   :  { %509 = vmatprep.subr.bf16.mxu1 %v508_v6  ;;  %545 = vmatprep.subr.bf16.mxu0 %v544_v60  ;;  %v566_v50 = vpack.c.bf16 %v309_v49, %v308_v48  ;;  %v204_v52 = vrot.slane %v199_v51, %v40_v63  ;;  %v208_v53 = vrot.slane %v199_v51, %v44_v1 }
  0x2c   :  { %511 = vmatpush1.bf16.msra.mxu1 %v510_v11 }
  0x2d   :  { %513 = vmatprep.subr.bf16.mxu1 %v512_v12 }
  0x30   :  { %515 = vmatpush1.bf16.msra.mxu1 %v514_v15 }
  0x31   :  { %517 = vmatprep.subr.bf16.mxu1 %v516_v18  ;;  %v298_v18 = vld [vmem:[%s1001_s5 + $0x20] sm:$0xff] }
  0x32   :  { %v546_v20 = vpack.c.bf16 %v299_v19, %v298_v18 }
  0x34   :  { %519 = vmatpush1.bf16.msra.mxu1 %v518_v21  ;;  %547 = vmatpush3.bf16.msra.mxu0 %v546_v20  ;;  %v316_v21 = vld [vmem:[%s1001_s5 + $0xb0] sm:$0xff] }
  0x35   :  { %521 = vmatprep.subr.bf16.mxu1 %v520_v24  ;;  %v548_v23 = vpack.c.bf16 %v317_v22, %v316_v21  ;;  %v300_v24 = vld [vmem:[%s1001_s5 + $0x30] sm:$0xff] }
  0x36   :  { %v550_v26 = vpack.c.bf16 %v301_v25, %v300_v24 }
  0x37   :  { %549 = vmatprep.subr.bf16.mxu0 %v548_v23 }
  0x38   :  { %523 = vmatpush1.bf16.msra.mxu1 %v522_v27  ;;  %551 = vmatpush3.bf16.msra.mxu0 %v550_v26  ;;  %v318_v27 = vld [vmem:[%s1001_s5 + $0xc0] sm:$0xff] }
  0x39   :  { %525 = vmatprep.subr.bf16.mxu1 %v524_v31  ;;  %v552_v29 = vpack.c.bf16 %v319_v28, %v318_v27  ;;  %v303_v31 = vld [vmem:[%s1001_s5 + $0x48] sm:$0xff] }
  0x3a   :  { %v554_v32 = vpack.c.bf16 %v303_v31, %v302_v30 }
  0x3b   :  { %553 = vmatprep.subr.bf16.mxu0 %v552_v29 }
  0x3c   :  { %527 = vmatpush1.bf16.msra.mxu1 %v526_v35  ;;  %555 = vmatpush3.bf16.msra.mxu0 %v554_v32  ;;  %v304_v35 = vld [vmem:[%s1001_s5 + $0x50] sm:$0xff] }
  0x3d   :  { %529 = vmatprep.subr.bf16.mxu1 %v528_v36  ;;  %v556_v36 = vpack.c.bf16 %v321_v34, %v320_v33  ;;  %v558_v40 = vpack.c.bf16 %v305_v37, %v304_v35 }
  0x3f   :  { %557 = vmatprep.subr.bf16.mxu0 %v556_v36 }
  0x40   :  { %531 = vmatpush1.bf16.msra.mxu1 %v530_v41  ;;  %v560_v41 = vpack.c.bf16 %v323_v39, %v322_v38  ;;  %559 = vmatpush3.bf16.msra.mxu0 %v558_v40 }
  0x41   :  { %533 = vmatprep.subr.bf16.mxu1 %v532_v42  ;;  %v306_v42 = vld [vmem:[%s1001_s5 + $0x60] sm:$0xff] }
  0x42   :  { %v562_v46 = vpack.c.bf16 %v307_v43, %v306_v42  ;;  %561 = vmatprep.subr.bf16.mxu0 %v560_v41 }
  0x44   :  { %535 = vmatpush1.bf16.msra.mxu1 %v534_v45  ;;  %v325_v45 = vld [vmem:[%s1001_s5 + $0xf8] sm:$0xff]  ;;  %563 = vmatpush3.bf16.msra.mxu0 %v562_v46 }
  0x45   :  { %v564_v47 = vpack.c.bf16 %v325_v45, %v324_v44 }
  0x47   :  { %565 = vmatprep.subr.bf16.mxu0 %v564_v47 }
  0x48   :  { %567 = vmatpush3.bf16.msra.mxu0 %v566_v50 }
  0xdf   :  { %v118_v4 = vpop.f32.mrb[0].mxu0 }
  0xe0   :  { %v119_v5 = vadd.f32 %v118_v4, %v41_v2  ;;  %v120_v6 = vpop.f32.mrb[1].mxu0 }
  0xe1   :  { %v121_v7 = vadd.f32 %v120_v6, %v45_v3 }
  0xe2   :  { %v125_v8 = vmin.f32 %v119_v5, 0.0  ;;  %vm123_vm2 = vcmp.gt.f32.partialorder %v119_v5, 0.0 }
  0xe3   :  { %v126_v9 = vmin.f32 %v121_v7, 0.0  ;;  %vm124_vm1 = vcmp.gt.f32.partialorder %v121_v7, 0.0 }
  0xe4   :  { %v127_v10 = vmul.f32 1.442695, %v125_v8 }
  0xe5   :  { %v129_v11 = vmul.f32 1.442695, %v126_v9 }
  0xe6   :  { %570 = vpow2.f32 %v127_v10 }
  0xe7   :  { %572 = vpow2.f32 %v129_v11 }
  0xf0   :  { %v571_v12 = vpop.eup %570 }
  0xf1   :  { %v573_v13 = vpop.eup %572  ;;  %v424_v14 = vadd.f32 -1.0, %v571_v12 }
  0xf2   :  { %v425_v15 = vadd.f32 -1.0, %v573_v13 }
  0xf3   :  { %v133_v17 = vsel %vm123_vm2, %v119_v5, %v424_v14  ;;  %v428_v5 = vld [vmem:[%s1002_s6] ss:$0 sm:$0xff] }
  0xf4   :  { %v134_v16 = vsel %vm124_vm1, %v121_v7, %v425_v15 }
  0xf5   :  { %275 = vmatprep.mubr.f32.mxu1 %v134_v16 }
  0xf6   :  { %276 = vmatmul.mubr.f32.vlgmr.msra.gmra.mrb[0].mxu1 %v133_v17 }
 0x1c9   :  { %v277_v54 = vpop.f32.mrb[0].mxu1 }
 0x1ca   :  { %v278_v55 = vadd.f32 %v277_v54, %v204_v52  ;;  %v279_v56 = vpop.f32.mrb[1].mxu1 }
 0x1cb   :  { %v280_v57 = vadd.f32 %v279_v56, %v208_v53 }
 0x1cc   :  { %v284_v58 = vmin.f32 %v278_v55, 0.0  ;;  %vm282_vm4 = vcmp.gt.f32.partialorder %v278_v55, 0.0 }
 0x1cd   :  { %v285_v59 = vmin.f32 %v280_v57, 0.0  ;;  %vm283_vm3 = vcmp.gt.f32.partialorder %v280_v57, 0.0 }
 0x1ce   :  { %v286_v60 = vmul.f32 1.442695, %v284_v58 }
 0x1cf   :  { %v288_v61 = vmul.f32 1.442695, %v285_v59 }
 0x1d0   :  { %574 = vpow2.f32 %v286_v60 }
 0x1d1   :  { %576 = vpow2.f32 %v288_v61 }
 0x1da   :  { %v575_v0 = vpop.eup %574 }
 0x1db   :  { %v577_v2 = vpop.eup %576  ;;  %v426_v3 = vadd.f32 -1.0, %v575_v0 }
 0x1dc   :  { %v427_v4 = vadd.f32 -1.0, %v577_v2 }
 0x1dd   :  { %v292_v62 = vsel %vm282_vm4, %v278_v55, %v426_v3 }
 0x1de   :  { %v293_v63 = vsel %vm283_vm3, %v280_v57, %v427_v4 }
 0x1df   :  { %397 = vmatprep.mubr.f32.mxu0 %v293_v63 }
 0x1e0   :  { %398 = vmatmul.mubr.f32.vlgmr.msra.gmra.mrb[2].mxu0 %v292_v62 }
 0x2b3   :  { %v461_v1 = vpop.f32.mrb[2].mxu0 }
 0x2b4   :  { %v462_v6 = vpop.f32.mrb[3].mxu0 }
 0x2b5   :  { %v463_v7 = vadd.f32 %v462_v6, %v461_v1 }
 0x2b7   :  { %v400_v8 = vadd.f32 %v463_v7, %v428_v5 }
 0x2b9   :  { %v403_v9 = vsub.f32 0.0, %v400_v8 }
 0x2bb   :  { %v404_v10 = vmul.f32 1.442695, %v403_v9 }
 0x2bd   :  { %578 = vpow2.f32 %v404_v10 }
 0x2c7   :  { %v579_v11 = vpop.eup %578 }
 0x2c8   :  { %v406_v12 = vadd.f32 1.0, %v579_v11 }
 0x2ca   :  { %580 = vrcp.f32 %v406_v12 }
 0x2d4   :  { %v581_v13 = vpop.eup %580 }
 0x2d5   :  { %408 = vst [vmem:[#allocation2] sm:$0xff] %v581_v13 }
 0x2d6   :  { %593 = shalt.err (!%p590_p4)
}
 0x2d7   :  { %s594_s15 = scalar_lea.hbm %s1003_s7, 128 }
 0x2d8   :  { %p595_p5 = scmp.ne.s32.totalorder %s1003_s7, %s594_s15  ;;  %p598_p6 = scmp.lt.u32.totalorder %s594_s15, %s1003_s7 }
 0x2da   :  { %p600_p7 = pnand %p598_p6, %p595_p5 }
 0x2dc   :  { %603 = shalt.err (!%p600_p7)
}
 0x2dd   :  { %418 = dma.vmem_to_hbm [thread:$0]  %s416_s12, 128, %s1003_s7, [#allocation3]  }
 0x2de   :  { %604 = dma.done.wait [#allocation3], 128  }
 0x2df   :  { %605 = vsyncadd [#allocation3], 4294967168 }
 0x2e0   :  { %422 = vsyncpa [#allocation3], 1 }

</bundles_post_ra>
